<compile_context>
chip_gen: v6e
topology: v6e:2x2x1
jax: 0.10.0
libtpu: 0.0.40
codegen_flags: <defaults>
</compile_context>

<pallas_src>
import functools

import jax
import jax.numpy as jnp
from jax import lax
from jax.experimental import pallas as pl
from jax.experimental.pallas import tpu as pltpu


def _conv3_fused(h, w_flat_ref, not_first, not_last, rows):
    """Fused 3-tap 'same' 1D conv as a single MXU matmul.

    h:          (rows, C) f32 activations (rows = batch_blk * seq_len)
    w_flat_ref: (3*C, Cout) bf16 ref, rows ordered [tap0(prev)|tap1(cur)|tap2(next)]
    not_first / not_last: (rows, 1) bool masks killing the circular-roll bleed
                          across sequence (and batch) boundaries.
    returns:    (rows, Cout) f32
    """
    zero = jnp.zeros_like(h)
    prev = jnp.where(not_first, pltpu.roll(h, shift=1, axis=0), zero)
    nxt = jnp.where(not_last, pltpu.roll(h, shift=rows - 1, axis=0), zero)
    stacked = jnp.concatenate([prev, h, nxt], axis=-1).astype(jnp.bfloat16)
    return jnp.dot(stacked, w_flat_ref[...], preferred_element_type=jnp.float32)


def decisioner_kernel(x_ref, w1_ref, a1_ref, w2_ref, a2_ref, wfc_ref, bfc_ref,
                      o_ref, *, seq_len, batch_blk):
    rows = batch_blk * seq_len
    x = x_ref[0]                                          # (rows, C_in) f32

    # Hoisted border masks: one iota, reused by both conv layers.
    r = lax.broadcasted_iota(jnp.int32, (rows, 1), 0)
    not_first = r != 0
    not_last = r != seq_len - 1
    for b in range(1, batch_blk):                         # static unroll (tiny)
        not_first = jnp.logical_and(not_first, r != b * seq_len)
        not_last = jnp.logical_and(not_last, r != (b + 1) * seq_len - 1)

    # conv1 + folded(bias, BN1) + relu     (dropout1 is identity in eval)
    a1 = a1_ref[...]                                      # (2, C_f): [scale; shift]
    h1 = _conv3_fused(x, w1_ref, not_first, not_last, rows)
    h1 = jnp.maximum(h1 * a1[0:1, :] + a1[1:2, :], 0.0)   # (rows, C_f) f32

    # conv2 + folded(bias, BN2) + relu     (dropout2 is identity in eval)
    a2 = a2_ref[...]
    h2 = _conv3_fused(h1, w2_ref, not_first, not_last, rows)
    h2 = jnp.maximum(h2 * a2[0:1, :] + a2[1:2, :], 0.0)   # (rows, C_f) f32

    # AdaptiveMaxPool1d(1): max over the length axis of each sequence.
    pooled = jnp.max(h2.reshape(batch_blk, seq_len, -1), axis=1)   # (batch_blk, C_f)

    # Batched fc (kept in f32 — tiny matmul, preserves precision).
    out = jnp.dot(pooled, wfc_ref[...], preferred_element_type=jnp.float32) \
          + bfc_ref[...]                                  # (batch_blk, num_classes)
    o_ref[0] = out


def decisioner_forward(x_ncl, params, grid_blocks=None):
    """x_ncl: (B, num_steps, L) float32  ->  (B, num_classes) float32."""
    w1f, a1, w2f, a2, wfc, bfc = params
    B, c_in, L = x_ncl.shape
    c_f = a1.shape[1]
    n_cls = wfc.shape[1]

    if grid_blocks is None:
        # Default: 2-way "parallel" grid axis so both v7x TensorCores get work.
        # On v5e/v6e (single TC) grid_blocks=1 fully collapses the grid.
        grid_blocks = 2 if (B % 2 == 0 and B >= 2) else 1
    assert B % grid_blocks == 0
    b_blk = B // grid_blocks
    rows = b_blk * L

    # Channel-last, then fold batch into the matmul M dimension.
    # TODO(synk): at production sizes produce channel-last input upstream to avoid
    # paying this extra HBM round-trip transpose before the kernel.
    x = jnp.transpose(x_ncl, (0, 2, 1)).astype(jnp.float32).reshape(grid_blocks, rows, c_in)

    # bf16 MXU operands; accumulation stays f32 via preferred_element_type.
    w1b = w1f.astype(jnp.bfloat16)
    w2b = w2f.astype(jnp.bfloat16)

    kernel = functools.partial(decisioner_kernel, seq_len=L, batch_blk=b_blk)

    out = pl.pallas_call(
        kernel,
        out_shape=jax.ShapeDtypeStruct((grid_blocks, b_blk, n_cls), jnp.float32),
        grid_spec=pltpu.PrefetchScalarGridSpec(
            num_scalar_prefetch=0,
            grid=(grid_blocks,),
            in_specs=[
                pl.BlockSpec((1, rows, c_in), lambda g: (g, 0, 0)),    # x block
                pl.BlockSpec((3 * c_in, c_f), lambda g: (0, 0)),       # w1 (fused taps)
                pl.BlockSpec((2, c_f), lambda g: (0, 0)),              # scale/shift 1
                pl.BlockSpec((3 * c_f, c_f), lambda g: (0, 0)),        # w2 (fused taps)
                pl.BlockSpec((2, c_f), lambda g: (0, 0)),              # scale/shift 2
                pl.BlockSpec((c_f, n_cls), lambda g: (0, 0)),          # wfc
                pl.BlockSpec((1, n_cls), lambda g: (0, 0)),            # bfc
            ],
            out_specs=pl.BlockSpec((1, b_blk, n_cls), lambda g: (g, 0, 0)),
        ),
        compiler_params=pltpu.CompilerParams(
            dimension_semantics=("parallel",)),
    )(x, w1b, a1, w2b, a2, wfc, bfc)
    return out.reshape(B, n_cls)


def make_params(key, num_classes, num_steps, num_filters, eps=1e-5):
    """Deterministic synthetic parameters (PyTorch layouts), folded for the kernel."""
    ks = jax.random.split(key, 6)
    # PyTorch layouts: conv (C_out, C_in, K), linear (out, in)
    w1_t = jax.random.normal(ks[0], (num_filters, num_steps, 3), jnp.float32) * 0.1
    b1_t = jax.random.normal(ks[1], (num_filters,), jnp.float32) * 0.1
    w2_t = jax.random.normal(ks[2], (num_filters, num_filters, 3), jnp.float32) * 0.1
    b2_t = jax.random.normal(ks[3], (num_filters,), jnp.float32) * 0.1
    wfc_t = jax.random.normal(ks[4], (num_classes, num_filters), jnp.float32) * 0.1
    bfc_t = jax.random.normal(ks[5], (num_classes,), jnp.float32) * 0.1
    # BatchNorm1d defaults (gamma=1, beta=0, running_mean=0, running_var=1)
    gamma = jnp.ones((num_filters,), jnp.float32)
    beta = jnp.zeros((num_filters,), jnp.float32)
    rmean = jnp.zeros((num_filters,), jnp.float32)
    rvar = jnp.ones((num_filters,), jnp.float32)

    def fold(bias, g, b, m, v):
        scale = g / jnp.sqrt(v + eps)
        shift = (bias - m) * scale + b
        return jnp.stack([scale, shift], axis=0)          # (2, C_f)

    a1 = fold(b1_t, gamma, beta, rmean, rvar)
    a2 = fold(b2_t, gamma, beta, rmean, rvar)

    # Fused-tap layout: (K, C_in, C_out) flattened to (K*C_in, C_out);
    # row order [tap0(prev) | tap1(cur) | tap2(next)] matches the in-kernel concat.
    w1f = jnp.transpose(w1_t, (2, 1, 0)).reshape(3 * num_steps, num_filters)
    w2f = jnp.transpose(w2_t, (2, 1, 0)).reshape(3 * num_filters, num_filters)
    wfc = wfc_t.T                                         # (C_f, num_classes)
    bfc = bfc_t[None, :]                                  # (1, num_classes)

    kernel_params = (w1f, a1, w2f, a2, wfc, bfc)
    torch_params = (w1_t, b1_t, w2_t, b2_t, wfc_t, bfc_t, gamma, beta, rmean, rvar)
    return kernel_params, torch_params


def reference_forward(x_ncl, torch_params, eps=1e-5):
    """Pure-JAX f32 reference matching PyTorch eval-mode forward."""
    (w1_t, b1_t, w2_t, b2_t, wfc_t, bfc_t, gamma, beta, rmean, rvar) = torch_params

    def conv1d(x, w, b):
        y = lax.conv_general_dilated(x, w, window_strides=(1,), padding=((1, 1),),
                                     dimension_numbers=('NCH', 'OIH', 'NCH'))
        return y + b[None, :, None]

    def bn(x):
        scale = gamma / jnp.sqrt(rvar + eps)
        return (x - rmean[None, :, None]) * scale[None, :, None] + beta[None, :, None]

    h = jax.nn.relu(bn(conv1d(x_ncl, w1_t, b1_t)))
    h = jax.nn.relu(bn(conv1d(h, w2_t, b2_t)))
    pooled = jnp.max(h, axis=-1)                          # (B, C_f)
    return pooled @ wfc_t.T + bfc_t[None, :]


if __name__ == "__main__":
    B, num_steps, L = 2, 8, 16
    num_filters, num_classes = 64, 4

    key = jax.random.PRNGKey(0)
    kx, kp = jax.random.split(key)
    x = jax.random.normal(kx, (B, num_steps, L), jnp.float32)

    kernel_params, torch_params = make_params(kp, num_classes, num_steps, num_filters)

    out = decisioner_forward(x, kernel_params)
    out = jax.block_until_ready(out)

    ref = reference_forward(x, torch_params)
    assert out.shape == (B, num_classes), out.shape
    # bf16 MXU operands (f32 accumulation) -> tolerance loosened vs the f32 reference.
    assert jnp.allclose(out, ref, atol=5e-2, rtol=5e-2), (out, ref)

    print("KERNEL_OK")
</pallas_src>

<mosaic_0001>
module attributes {stable_mosaic.version = 11 : i64} {
  func.func @decisioner_kernel(%arg0: i32, %arg1: memref<1x16x8xf32, #tpu.memory_space<vmem>>, %arg2: memref<24x64xbf16, #tpu.memory_space<vmem>>, %arg3: memref<2x64xf32, #tpu.memory_space<vmem>>, %arg4: memref<192x64xbf16, #tpu.memory_space<vmem>>, %arg5: memref<2x64xf32, #tpu.memory_space<vmem>>, %arg6: memref<64x4xf32, #tpu.memory_space<vmem>>, %arg7: memref<1x4xf32, #tpu.memory_space<vmem>>, %arg8: memref<1x1x4xf32, #tpu.memory_space<vmem>>) attributes {dimension_semantics = [#tpu.dimension_semantics<parallel>], iteration_bounds = array<i64: 2>, scalar_prefetch = 0 : i64, scratch_operands = 0 : i64, tpu.core_type = #tpu.core_type<tc>, window_params = [{transform_indices = @transform_0, window_bounds = array<i64: 1, 16, 8>}, {pipeline_mode = #tpu.pipeline_mode<synchronous>, transform_indices = @transform_1, window_bounds = array<i64: 24, 64>}, {pipeline_mode = #tpu.pipeline_mode<synchronous>, transform_indices = @transform_2, window_bounds = array<i64: 2, 64>}, {pipeline_mode = #tpu.pipeline_mode<synchronous>, transform_indices = @transform_3, window_bounds = array<i64: 192, 64>}, {pipeline_mode = #tpu.pipeline_mode<synchronous>, transform_indices = @transform_4, window_bounds = array<i64: 2, 64>}, {pipeline_mode = #tpu.pipeline_mode<synchronous>, transform_indices = @transform_5, window_bounds = array<i64: 64, 4>}, {pipeline_mode = #tpu.pipeline_mode<synchronous>, transform_indices = @transform_6, window_bounds = array<i64: 1, 4>}, {transform_indices = @transform_7, window_bounds = array<i64: 1, 1, 4>}]} {
    %c0 = arith.constant 0 : index
    %c0_0 = arith.constant 0 : index
    %c0_1 = arith.constant 0 : index
    %0 = vector.load %arg1[%c0, %c0_0, %c0_1] : memref<1x16x8xf32, #tpu.memory_space<vmem>>, vector<1x16x8xf32>
    %1 = vector.shape_cast %0 : vector<1x16x8xf32> to vector<16x8xf32>
    %2 = tpu.iota {dimensions = array<i32: 0>} : vector<16x1xi32>
    %c0_i32 = arith.constant 0 : i32
    %3 = vector.broadcast %c0_i32 : i32 to vector<16x1xi32>
    %4 = arith.cmpi ne, %2, %3 : vector<16x1xi32>
    %c15_i32 = arith.constant 15 : i32
    %5 = vector.broadcast %c15_i32 : i32 to vector<16x1xi32>
    %6 = arith.cmpi ne, %2, %5 : vector<16x1xi32>
    %c0_2 = arith.constant 0 : index
    %c0_3 = arith.constant 0 : index
    %7 = vector.load %arg3[%c0_2, %c0_3] : memref<2x64xf32, #tpu.memory_space<vmem>>, vector<2x64xf32>
    %cst = arith.constant 0.000000e+00 : f32
    %8 = vector.broadcast %cst : f32 to vector<16x8xf32>
    %c1_i32 = arith.constant 1 : i32
    %9 = tpu.dynamic_rotate %1 by %c1_i32 dim 0 : vector<16x8xf32>, i32 -> vector<16x8xf32>
    %10 = vector.shape_cast %4 : vector<16x1xi1> to vector<16x1xi1>
    %11 = vector.broadcast %10 : vector<16x1xi1> to vector<16x8xi1>
    %12 = arith.select %11, %9, %8 : vector<16x8xi1>, vector<16x8xf32>
    %c15_i32_4 = arith.constant 15 : i32
    %13 = tpu.dynamic_rotate %1 by %c15_i32_4 dim 0 : vector<16x8xf32>, i32 -> vector<16x8xf32>
    %14 = vector.shape_cast %6 : vector<16x1xi1> to vector<16x1xi1>
    %15 = vector.broadcast %14 : vector<16x1xi1> to vector<16x8xi1>
    %16 = arith.select %15, %13, %8 : vector<16x8xi1>, vector<16x8xf32>
    %17 = tpu.concatenate %12, %1, %16 in 1 : vector<16x8xf32>, vector<16x8xf32>, vector<16x8xf32> -> vector<16x24xf32>
    %18 = arith.truncf %17 : vector<16x24xf32> to vector<16x24xbf16>
    %c0_5 = arith.constant 0 : index
    %c0_6 = arith.constant 0 : index
    %19 = vector.load %arg2[%c0_5, %c0_6] : memref<24x64xbf16, #tpu.memory_space<vmem>>, vector<24x64xbf16>
    %cst_7 = arith.constant dense<0.000000e+00> : vector<16x64xf32>
    %20 = tpu.matmul %18, %19, %cst_7 {dimension_numbers = #tpu.dot_dimension_numbers<[1], [0], [0], [1], [0, 0, 1, 1], [], []>} : vector<16x24xbf16>, vector<24x64xbf16>, vector<16x64xf32> -> vector<16x64xf32>
    %21 = vector.extract_strided_slice %7 {offsets = [0, 0], sizes = [1, 64], strides = [1, 1]} : vector<2x64xf32> to vector<1x64xf32>
    %22 = vector.broadcast %21 : vector<1x64xf32> to vector<16x64xf32>
    %23 = arith.mulf %20, %22 : vector<16x64xf32>
    %24 = vector.extract_strided_slice %7 {offsets = [1, 0], sizes = [1, 64], strides = [1, 1]} : vector<2x64xf32> to vector<1x64xf32>
    %25 = vector.broadcast %24 : vector<1x64xf32> to vector<16x64xf32>
    %26 = arith.addf %23, %25 : vector<16x64xf32>
    %cst_8 = arith.constant 0.000000e+00 : f32
    %27 = vector.broadcast %cst_8 : f32 to vector<16x64xf32>
    %28 = arith.maximumf %26, %27 : vector<16x64xf32>
    %c0_9 = arith.constant 0 : index
    %c0_10 = arith.constant 0 : index
    %29 = vector.load %arg5[%c0_9, %c0_10] : memref<2x64xf32, #tpu.memory_space<vmem>>, vector<2x64xf32>
    %cst_11 = arith.constant 0.000000e+00 : f32
    %30 = vector.broadcast %cst_11 : f32 to vector<16x64xf32>
    %c1_i32_12 = arith.constant 1 : i32
    %31 = tpu.dynamic_rotate %28 by %c1_i32_12 dim 0 : vector<16x64xf32>, i32 -> vector<16x64xf32>
    %32 = vector.shape_cast %4 : vector<16x1xi1> to vector<16x1xi1>
    %33 = vector.broadcast %32 : vector<16x1xi1> to vector<16x64xi1>
    %34 = arith.select %33, %31, %30 : vector<16x64xi1>, vector<16x64xf32>
    %c15_i32_13 = arith.constant 15 : i32
    %35 = tpu.dynamic_rotate %28 by %c15_i32_13 dim 0 : vector<16x64xf32>, i32 -> vector<16x64xf32>
    %36 = vector.shape_cast %6 : vector<16x1xi1> to vector<16x1xi1>
    %37 = vector.broadcast %36 : vector<16x1xi1> to vector<16x64xi1>
    %38 = arith.select %37, %35, %30 : vector<16x64xi1>, vector<16x64xf32>
    %39 = tpu.concatenate %34, %28, %38 in 1 : vector<16x64xf32>, vector<16x64xf32>, vector<16x64xf32> -> vector<16x192xf32>
    %40 = arith.truncf %39 : vector<16x192xf32> to vector<16x192xbf16>
    %c0_14 = arith.constant 0 : index
    %c0_15 = arith.constant 0 : index
    %41 = vector.load %arg4[%c0_14, %c0_15] : memref<192x64xbf16, #tpu.memory_space<vmem>>, vector<192x64xbf16>
    %cst_16 = arith.constant dense<0.000000e+00> : vector<16x64xf32>
    %42 = tpu.matmul %40, %41, %cst_16 {dimension_numbers = #tpu.dot_dimension_numbers<[1], [0], [0], [1], [0, 0, 1, 1], [], []>} : vector<16x192xbf16>, vector<192x64xbf16>, vector<16x64xf32> -> vector<16x64xf32>
    %43 = vector.extract_strided_slice %29 {offsets = [0, 0], sizes = [1, 64], strides = [1, 1]} : vector<2x64xf32> to vector<1x64xf32>
    %44 = vector.broadcast %43 : vector<1x64xf32> to vector<16x64xf32>
    %45 = arith.mulf %42, %44 : vector<16x64xf32>
    %46 = vector.extract_strided_slice %29 {offsets = [1, 0], sizes = [1, 64], strides = [1, 1]} : vector<2x64xf32> to vector<1x64xf32>
    %47 = vector.broadcast %46 : vector<1x64xf32> to vector<16x64xf32>
    %48 = arith.addf %45, %47 : vector<16x64xf32>
    %cst_17 = arith.constant 0.000000e+00 : f32
    %49 = vector.broadcast %cst_17 : f32 to vector<16x64xf32>
    %50 = arith.maximumf %48, %49 : vector<16x64xf32>
    %51 = vector.shape_cast %50 : vector<16x64xf32> to vector<1x16x64xf32>
    %cst_18 = arith.constant dense<0xFF800000> : vector<1x64xf32>
    %52 = vector.multi_reduction <maximumf>, %51, %cst_18 [1] : vector<1x16x64xf32> to vector<1x64xf32>
    %c0_19 = arith.constant 0 : index
    %c0_20 = arith.constant 0 : index
    %53 = vector.load %arg6[%c0_19, %c0_20] : memref<64x4xf32, #tpu.memory_space<vmem>>, vector<64x4xf32>
    %cst_21 = arith.constant dense<0.000000e+00> : vector<1x4xf32>
    %54 = tpu.matmul %52, %53, %cst_21 {dimension_numbers = #tpu.dot_dimension_numbers<[1], [0], [0], [1], [0, 0, 1, 1], [], []>} : vector<1x64xf32>, vector<64x4xf32>, vector<1x4xf32> -> vector<1x4xf32>
    %c0_22 = arith.constant 0 : index
    %c0_23 = arith.constant 0 : index
    %55 = vector.load %arg7[%c0_22, %c0_23] : memref<1x4xf32, #tpu.memory_space<vmem>>, vector<1x4xf32>
    %56 = arith.addf %54, %55 : vector<1x4xf32>
    %c0_24 = arith.constant 0 : index
    %c0_25 = arith.constant 0 : index
    %c0_26 = arith.constant 0 : index
    %57 = vector.load %arg8[%c0_24, %c0_25, %c0_26] : memref<1x1x4xf32, #tpu.memory_space<vmem>>, vector<1x1x4xf32>
    %58 = vector.shape_cast %57 : vector<1x1x4xf32> to vector<1x4xf32>
    %59 = vector.shape_cast %56 : vector<1x4xf32> to vector<1x1x4xf32>
    tpu.vector_store %arg8[%c0_24, %c0_25, %c0_26], %59 {strides = array<i32>} : memref<1x1x4xf32, #tpu.memory_space<vmem>>, vector<1x1x4xf32>,
    return
  }
  func.func @transform_0(%arg0: i32) -> (i32, i32, i32) {
    %c0_i32 = arith.constant 0 : i32
    %c0_i32_0 = arith.constant 0 : i32
    %c0_i32_1 = arith.constant 0 : i32
    return %arg0, %c0_i32, %c0_i32_0 : i32, i32, i32
  }
  func.func @transform_1(%arg0: i32) -> (i32, i32) {
    %c0_i32 = arith.constant 0 : i32
    %c0_i32_0 = arith.constant 0 : i32
    %c0_i32_1 = arith.constant 0 : i32
    return %c0_i32, %c0_i32_0 : i32, i32
  }
  func.func @transform_2(%arg0: i32) -> (i32, i32) {
    %c0_i32 = arith.constant 0 : i32
    %c0_i32_0 = arith.constant 0 : i32
    %c0_i32_1 = arith.constant 0 : i32
    return %c0_i32, %c0_i32_0 : i32, i32
  }
  func.func @transform_3(%arg0: i32) -> (i32, i32) {
    %c0_i32 = arith.constant 0 : i32
    %c0_i32_0 = arith.constant 0 : i32
    %c0_i32_1 = arith.constant 0 : i32
    return %c0_i32, %c0_i32_0 : i32, i32
  }
  func.func @transform_4(%arg0: i32) -> (i32, i32) {
    %c0_i32 = arith.constant 0 : i32
    %c0_i32_0 = arith.constant 0 : i32
    %c0_i32_1 = arith.constant 0 : i32
    return %c0_i32, %c0_i32_0 : i32, i32
  }
  func.func @transform_5(%arg0: i32) -> (i32, i32) {
    %c0_i32 = arith.constant 0 : i32
    %c0_i32_0 = arith.constant 0 : i32
    %c0_i32_1 = arith.constant 0 : i32
    return %c0_i32, %c0_i32_0 : i32, i32
  }
  func.func @transform_6(%arg0: i32) -> (i32, i32) {
    %c0_i32 = arith.constant 0 : i32
    %c0_i32_0 = arith.constant 0 : i32
    %c0_i32_1 = arith.constant 0 : i32
    return %c0_i32, %c0_i32_0 : i32, i32
  }
  func.func @transform_7(%arg0: i32) -> (i32, i32, i32) {
    %c0_i32 = arith.constant 0 : i32
    %c0_i32_0 = arith.constant 0 : i32
    %c0_i32_1 = arith.constant 0 : i32
    return %arg0, %c0_i32, %c0_i32_0 : i32, i32, i32
  }
}

</mosaic_0001>

<bundles_post_ra>
// kernel: tpu_custom_call.1
= control target key start
LH: loop header
LB: loop body
LE: loop exit
PB: predicated region body
PF: predicated region fallthrough
CT: control target
= control target key end

     0   :  { %12 = vsyncpa [#allocation3], 0  ;;  %s1228_s0 = inlined_call_operand.vmem [shape: f32[2,16,8], index: 0, kind: input, shape index: {}]   ;;  %s1229_s1 = inlined_call_operand.vmem [shape: bf16[24,64], index: 1, kind: input, shape index: {}]   ;;  %s1230_s2 = inlined_call_operand.vmem [shape: f32[2,64], index: 2, kind: input, shape index: {}]   ;;  %s1231_s3 = inlined_call_operand.vmem [shape: bf16[192,64], index: 3, kind: input, shape index: {}]   ;;  %s1232_s4 = inlined_call_operand.vmem [shape: f32[2,64], index: 4, kind: input, shape index: {}]   ;;  %s1233_s5 = inlined_call_operand.vmem [shape: f32[64,4], index: 5, kind: input, shape index: {}]   ;;  %s1234_s6 = inlined_call_operand.vmem [shape: f32[1,4], index: 6, kind: input, shape index: {}]   ;;  %s1235_s7 = inlined_call_operand.hbm [shape: f32[2,1,4], index: 7, kind: output, shape index: {}]  }
   0x1   :  { %14 = vsyncpa [#allocation3 + $0x1], 0  ;;  %s997_s24 = smov 0   ;;  %s999_s25 = smov 0  }
   0x2   :  { %s1001_s26 = smov 0   ;;  %s1003_s27 = smov 0  }
   0x3 LB: > { %s1018_s28 = sadd.s32 4294967295, %s948_s27   ;;  %s748_s29 = sadd.s32 4294967294, %s948_s27   ;;  %s948_s27 = sphi %s1003_s27, %s1241_s27   ;;  %s944_s26 = sphi %s1001_s26, %s1240_s26   ;;  %s940_s25 = sphi %s999_s25, %s1239_s25   ;;  %s936_s24 = sphi %s997_s24, %s1238_s24  }
   0x4   : > { %s1022_s30 = sadd.s32 1, %s948_s27   ;;  %s179_s8 = sadd.s32 1, %s944_s26 }
   0x5   : > { %s176_s9 = ssub.s32 %s948_s27, %s1022_s30  ;;  %p189_p0 = scmp.ne.s32.totalorder %s944_s26, %s940_s25 }
   0x6   : > { %p177_p1 = scmp.eq.s32.totalorder %s176_s9, 0  ;;  %p190_p2 = scmp.eq.s32.totalorder %s1018_s28, 1 }
   0x7   : > { %p195_p3 = scmp.ne.s32.totalorder %s940_s25, %s936_s24  ;;  %p196_p4 = scmp.eq.s32.totalorder %s748_s29, 1 }
   0x8   : > { %s1033_s10 = scalar_select %p177_p1, %s944_s26, %s179_s8  }
   0x9   : > { %p1035_p5 = por %p190_p2, %p189_p0  ;;  %p1039_p6 = por %p196_p4, %p195_p3 }
   0xa   : > { %p751_p7 = scmp.ge.s32.totalorder %s948_s27, 1  ;;  %p240_p8 = scmp.lt.s32.totalorder %s948_s27, 3 }
   0xc   : > { %p241_p9 = pnand %p751_p7, %p240_p8 }
   0xd   : > { %p271_p10 = scmp.lt.s32.totalorder (!%p241_p9), %s1018_s28, 1  ;;  %s952_s22 = smov (!%p241_p9), 8  }
   0xe   : > { %244 = sbr.rel (%p241_p9) target bundleno = 902 (0x386), region = 48  ;;  %s953_s23 = smov (!%p241_p9), 16  }
   0xf   : > { %s269_s13 = sand.u32 (!%p241_p9), 1, %s940_s25  }
  0x10   : > { %s270_s17 = scalar_lea.vmem (!%p241_p9), [#allocation2], %s269_s13 }
  0x11   : > { %s693_s18 = sshll.u32 (!%p241_p9), %s270_s17, 4  ;;  %s694_s18 = int_to_ptr.vmem [resolvable:$true] %s693_s18 }
  0x13   : > { %v279_v0 = vlaneseq  ;;  %v950_v1 = vmov 0.0   ;;  %v874_v2 = vld [vmem:[%s1229_s1 + $0x8] ss:$0 sps:$4 sm:$0xff]   ;;  %vm348_vm0 = vcmask 1043456   ;;  %s272_s15 = scalar_select %p271_p10, %s1018_s28, 1  ;;  %v875_v6 = vld [vmem:[%s1229_s1] sm:$0xff]  }
  0x14   : > { %787 = vmatprep.subr.bf16.mxu0 %v950_v1  ;;  %v350_v4 = vsel %vm348_vm0, %v874_v2, 0  ;;  %vm951_vm3 = vmmov 0   ;;  %vm325_vm6 = vcmask 64512   ;;  %vm328_vm7 = vcmask 130048   ;;  %v876_v32 = vld [vmem:[%s1231_s3 + $0x38] sm:$0xff]   ;;  %v877_v34 = vld [vmem:[%s1231_s3 + $0x30] sm:$0xff]  }
  0x15   : > { %v1051_v3 = vshrl.u32 %v279_v0, 7  ;;  %s774_s16 = sshll.u32 %s272_s15, 4  ;;  %788 = vmatpush3.bf16.msra.mxu0 %v350_v4  ;;  %791 = vmatprep.mubr.msk.bf16.mxu0 %vm951_vm3, %v950_v1  ;;  %vm344_vm8 = vcmask 195584   ;;  %v954_v33 = vmov 0   ;;  %v878_v35 = vld [vmem:[%s1231_s3 + $0x28] sm:$0xff]   ;;  %v879_v36 = vld [vmem:[%s1231_s3 + $0x20] sm:$0xff]  }
  0x16   : > { %s275_s21 = scalar_lea.vmem %s1228_s0, %s774_s16  ;;  %789 = vmatprep.subr.bf16.mxu0 %v950_v1  ;;  %532 = vmatprep.subr.bf16.mxu1 %v954_v33  ;;  %v880_v37 = vld [vmem:[%s1231_s3 + $0x18] sm:$0xff]   ;;  %v881_v38 = vld [vmem:[%s1231_s3 + $0x10] sm:$0xff]   ;;  %v882_v39 = vld [vmem:[%s1231_s3 + $0x8] sm:$0xff]   ;;  %vm428_vm9 = vcmask 523264   ;;  %s771_s16 = sshll.u32 %s1018_s28, 4  ;;  %vm678_vm10 = vcmask 24576  }
  0x17   : > { %v1054_v5 = vadd.s32 8, %v1051_v3  ;;  %v277_v7 = vld [vmem:[%s275_s21] sm:$0xff]  ;;  %v278_v8 = vld [vmem:[%s275_s21 + $0x8] sm:$0xff]  ;;  %vm300_vm1 = vcmp.lt.s32.totalorder %v1051_v3, 7  ;;  %vm289_vm2 = vcmp.lt.s32.totalorder %v1051_v3, 1  ;;  %vm282_vm5 = vcmp.ne.s32.totalorder %v1051_v3, 0  ;;  %533 = vmatpush1.bf16.msra.mxu1 %v876_v32  ;;  %s1193_s21 = scalar_lea.hbm %s1235_s7, %s771_s16 }
  0x18   : > { %v288_v9 = vrot.slane %v278_v8, 7  ;;  %v299_v10 = vrot.slane %v278_v8, 1  ;;  %v859_v11 = vpack.i.bf16 %v278_v8, %v277_v7  ;;  %v287_v12 = vrot.slane %v277_v7, 7  ;;  %534 = vmatprep.subr.bf16.mxu1 %v954_v33  ;;  %v883_v40 = vld [vmem:[%s1231_s3] sm:$0xff]   ;;  %v884_v41 = vld [vmem:[%s1231_s3 + $0x58] sm:$0xff]   ;;  %v885_v42 = vld [vmem:[%s1231_s3 + $0x50] sm:$0xff]  }
  0x19   : > { %v298_v13 = vrot.slane %v277_v7, 1  ;;  %vm285_vm4 = vcmp.ne.s32.totalorder %v1054_v5, 15  ;;  %790 = vmatpush3.bf16.msra.mxu0 %v875_v6  ;;  %v886_v43 = vld [vmem:[%s1231_s3 + $0x48] sm:$0xff]   ;;  %v395_v44 = vsub.s32 0, %v1051_v3  ;;  %v286_v45 = vld [vmem:[%s1230_s2] sm:$0x3] }
  0x1a   : > { %860 = vrot.lane.b32.xlu0 %v859_v11, %s952_s22  ;;  %v290_v14 = vsel %vm289_vm2, %v287_v12, %v288_v9  ;;  %v291_v15 = vsel %vm289_vm2, %v288_v9, %v287_v12  ;;  %795 = vmatprep.subr.mxu0 %v950_v1  ;;  %v401_v46 = vsub.s32 1, %v1051_v3  ;;  %v887_v50 = vld [vmem:[%s1231_s3 + $0x40] sm:$0xff]   ;;  %s955_s22 = smov 64   ;;  %v603_v5 = vld [vmem:[%s1233_s5 + $0x38] sm:$0xff]  ;;  %s956_s28 = smov [#allocation2]  }
  0x1b   : > { %v301_v16 = vsel %vm300_vm1, %v298_v13, %v299_v10  ;;  %v302_v17 = vsel %vm300_vm1, %v299_v10, %v298_v13  ;;  %v296_v23 = vsel %vm282_vm5, %v291_v15, 0.0  ;;  %535 = vmatpush1.bf16.msra.mxu1 %v877_v34  ;;  %v396_v47 = vrot.slane %v286_v45, %v395_v44  ;;  %s892_s29 = sshll.u32 %s956_s28, 4  ;;  %s893_s29 = int_to_ptr.vmem [resolvable:$false] %s892_s29 }
  0x1c   : > { %v308_v18 = vsel %vm285_vm4, %v302_v17, 0.0  ;;  %536 = vmatprep.subr.bf16.mxu1 %v954_v33  ;;  %v402_v48 = vrot.slane %v286_v45, %v401_v46  ;;  %v602_v17 = vld [vmem:[%s1233_s5 + $0x30] sm:$0xff]  ;;  %s894_s8 = scalar_lea.vmem %s893_s29, 32  ;;  %p895_p0 = scmp.lt.s32.totalorder %s694_s18, %s893_s29 }
  0x1d   : > { %v864_v19 = vpack.i.bf16 %v308_v18, %v301_v16  ;;  %v601_v18 = vld [vmem:[%s1233_s5 + $0x28] sm:$0xff] }
  0x1f   : > { %865 = vrot.lane.b32.xlu0 %v864_v19, %s953_s23  ;;  %537 = vmatpush1.bf16.msra.mxu1 %v878_v35  ;;  %v600_v19 = vld [vmem:[%s1233_s5 + $0x20] sm:$0xff]  ;;  %s888_s23 = scalar_lea.vmem %s694_s18, 16 }
  0x20   : > { %538 = vmatprep.subr.bf16.mxu1 %v954_v33  ;;  %p889_p11 = scmp.ne.s32.totalorder %s694_s18, %s888_s23  ;;  %p896_p1 = scmp.lt.s32.totalorder %s894_s8, %s888_s23 }
  0x22   : > { %p890_p12 = pnand %p889_p11, %p1035_p5  ;;  %p897_p2 = por %p896_p1, %p895_p0 }
  0x23   : > { %539 = vmatpush1.bf16.msra.mxu1 %v879_v36 }
  0x24   : > { %540 = vmatprep.subr.bf16.mxu1 %v954_v33  ;;  %p891_p13 = pneg %p890_p12 }
  0x26   : > { %p898_p3 = pnand %p897_p2, %p891_p13 }
  0x27   : > { %541 = vmatpush1.bf16.msra.mxu1 %v880_v37 }
  0x28   : > { %542 = vmatprep.subr.bf16.mxu1 %v954_v33 }
  0x2b   : > { %543 = vmatpush1.bf16.msra.mxu1 %v881_v38 }
  0x2c   : > { %544 = vmatprep.subr.bf16.mxu1 %v954_v33 }
  0x2f   : > { %545 = vmatpush1.bf16.msra.mxu1 %v882_v39 }
  0x30   : > { %546 = vmatprep.subr.bf16.mxu1 %v954_v33 }
  0x33   : > { %547 = vmatpush1.bf16.msra.mxu1 %v883_v40 }
  0x34   : > { %556 = vmatprep.subr.bf16.mxu1 %v954_v33 }
  0x37   : > { %557 = vmatpush2.bf16.msra.mxu1 %v884_v41 }
  0x38   : > { %558 = vmatprep.subr.bf16.mxu1 %v954_v33 }
  0x3b   : > { %559 = vmatpush2.bf16.msra.mxu1 %v885_v42 }
  0x3c   : > { %560 = vmatprep.subr.bf16.mxu1 %v954_v33 }
  0x3f   : > { %561 = vmatpush2.bf16.msra.mxu1 %v886_v43 }
  0x40   : > { %562 = vmatprep.subr.bf16.mxu1 %v954_v33 }
  0x43   : > { %563 = vmatpush2.bf16.msra.mxu1 %v887_v50 }
  0x8c   : > { %v861_v20 = vpop.permute.xlu0 %860 }
  0x8d   : > { %v863_v21 = vunpack.i.h.bf16 %v861_v20  ;;  %v862_v22 = vunpack.i.l.bf16 %v861_v20  ;;  %v599_v20 = vld [vmem:[%s1233_s5 + $0x18] sm:$0xff] }
  0x8f   : > { %v326_v27 = vsel %vm325_vm6, %v296_v23, %v862_v22  ;;  %v327_v28 = vsel %vm325_vm6, %v290_v14, %v863_v21  ;;  %v598_v21 = vld [vmem:[%s1233_s5 + $0x10] sm:$0xff]  ;;  %v597_v22 = vld [vmem:[%s1233_s5 + $0x8] sm:$0xff]  ;;  %v596_v23 = vld [vmem:[%s1233_s5] sm:$0xff] }
  0x91   : > { %v866_v24 = vpop.permute.xlu0 %865 }
  0x92   : > { %v868_v25 = vunpack.i.h.bf16 %v866_v24  ;;  %v867_v26 = vunpack.i.l.bf16 %v866_v24  ;;  %v407_v24 = vld [vmem:[%s1232_s4] sm:$0x3] }
  0x94   : > { %v329_v29 = vsel %vm328_vm7, %v326_v27, %v867_v26  ;;  %v330_v30 = vsel %vm328_vm7, %v327_v28, %v868_v25  ;;  %v576_v25 = vrot.slane %v407_v24, %v395_v44  ;;  %v582_v26 = vrot.slane %v407_v24, %v401_v46  ;;  %v604_v44 = vld [vmem:[%s1234_s6] sm:$0x1] }
  0x95   : > { %v331_v31 = vpack.c.bf16 %v330_v30, %v329_v29 }
  0x97   : > { %792 = vmatmul.mubr.msk.bf16.vlgmr.msra.gmra.mxu0 %vm344_vm8, %v331_v31 }
  0x98   : > { %811 = vmatprep.mubr.msk.f32.mxu0 %vm951_vm3, %v950_v1  ;;  %796 = vmatpush3.msra.mxu0 %v603_v5 }
  0x99   : > { %797 = vmatprep.subr.mxu0 %v950_v1 }
  0x9a   : > { %798 = vmatpush3.msra.mxu0 %v602_v17 }
  0x9b   : > { %799 = vmatprep.subr.mxu0 %v950_v1 }
  0x9c   : > { %800 = vmatpush3.msra.mxu0 %v601_v18 }
  0x9d   : > { %801 = vmatprep.subr.mxu0 %v950_v1 }
  0x9e   : > { %802 = vmatpush3.msra.mxu0 %v600_v19 }
  0x9f   : > { %803 = vmatprep.subr.mxu0 %v950_v1 }
  0xa0   : > { %804 = vmatpush3.msra.mxu0 %v599_v20 }
  0xa1   : > { %805 = vmatprep.subr.mxu0 %v950_v1 }
  0xa2   : > { %806 = vmatpush3.msra.mxu0 %v598_v21 }
  0xa3   : > { %807 = vmatprep.subr.mxu0 %v950_v1 }
  0xa4   : > { %808 = vmatpush3.msra.mxu0 %v597_v22 }
  0xa5   : > { %809 = vmatprep.subr.mxu0 %v950_v1 }
  0xa6   : > { %810 = vmatpush3.msra.mxu0 %v596_v23 }
 0x157   : > { %v386_v49 = vpop.f32.mrf.mxu0 }
 0x158   : > { %v397_v51 = vmul.f32 %v396_v47, %v386_v49 }
 0x159   : > { %v793_v52 = vpop.f32.mrf.mxu0 }
 0x15a   : > { %v403_v53 = vadd.f32 %v402_v48, %v397_v51 }
 0x15b   : > { %v389_v54 = vpop.f32.mrf.mxu0 }
 0x15c   : > { %v398_v55 = vmul.f32 %v396_v47, %v389_v54  ;;  %v405_v56 = vmax.f32 %v403_v53, 0.0 }
 0x15d   : > { %v794_v57 = vpop.f32.mrf.mxu0 }
 0x15e   : > { %v404_v58 = vadd.f32 %v402_v48, %v398_v55  ;;  %v408_v60 = vrot.slane %v405_v56, 7  ;;  %v414_v63 = vrot.slane %v405_v56, 1 }
 0x160   : > { %v406_v59 = vmax.f32 %v404_v58, 0.0 }
 0x162   : > { %v409_v61 = vrot.slane %v406_v59, 7  ;;  %v869_v62 = vpack.i.bf16 %v406_v59, %v405_v56  ;;  %v415_v0 = vrot.slane %v406_v59, 1 }
 0x164   : > { %870 = vrot.lane.b32.xlu1 %v869_v62, %s955_s22  ;;  %v416_v2 = vsel %vm300_vm1, %v414_v63, %v415_v0  ;;  %v417_v4 = vsel %vm300_vm1, %v415_v0, %v414_v63  ;;  %v410_v6 = vsel %vm289_vm2, %v408_v60, %v409_v61  ;;  %v411_v7 = vsel %vm289_vm2, %v409_v61, %v408_v60  ;;  %s681_s22 = scalar_lea.sflag [#allocation3], %s269_s13 }
 0x165   : > { %v419_v8 = vsel %vm285_vm4, %v417_v4, 0.0  ;;  %v412_v13 = vsel %vm282_vm5, %v411_v7, 0.0 }
 0x166   : > { %v432_v9 = vpack.c.bf16 %v419_v8, %v416_v2 }
 0x168   : > { %769 = vmatprep.mubr.msk.bf16.mxu1 %vm428_vm9, %v432_v9 }
 0x1d6   : > { %v871_v10 = vpop.permute.xlu1 %870 }
 0x1d7   : > { %v873_v11 = vunpack.i.h.bf16 %v871_v10  ;;  %v872_v12 = vunpack.i.l.bf16 %v871_v10 }
 0x1d9   : > { %v429_v14 = vsel %vm428_vm9, %v412_v13, %v872_v12  ;;  %v430_v15 = vsel %vm428_vm9, %v410_v6, %v873_v11 }
 0x1da   : > { %v431_v16 = vpack.c.bf16 %v430_v15, %v429_v14 }
 0x1dc   : > { %565 = vmatmul.mubr.bf16.vlgmr.msra.gmra.mxu1 %v431_v16 }
 0x29c   : > { %v566_v27 = vpop.f32.mrf.mxu1 }
 0x29d   : > { %v577_v28 = vmul.f32 %v576_v25, %v566_v27 }
 0x29e   : > { %v568_v29 = vpop.f32.mrf.mxu1 }
 0x29f   : > { %v583_v30 = vadd.f32 %v582_v26, %v577_v28 }
 0x2a0   : > { %v569_v31 = vpop.f32.mrf.mxu1 }
 0x2a1   : > { %v578_v32 = vmul.f32 %v576_v25, %v569_v31  ;;  %v585_v1 = vmax.f32 %v583_v30, 0.0 }
 0x2a2   : > { %v571_v33 = vpop.f32.mrf.mxu1 }
 0x2a3   : > { %v584_v34 = vadd.f32 %v582_v26, %v578_v32  ;;  %v587_v36 = vsel %vm428_vm9, %v585_v1, -inf }
 0x2a5   : > { %v586_v35 = vmax.f32 %v584_v34, 0.0 }
 0x2a7   : > { %v588_v37 = vsel %vm428_vm9, %v586_v35, -inf }
 0x2a8   : > { %v589_v38 = vmax.f32 %v587_v36, %v588_v37 }
 0x2aa   : > { %v590_v39 = vrot.slane %v589_v38, 4 }
 0x2ac   : > { %v591_v3 = vmax.f32 %v589_v38, %v590_v39 }
 0x2ae   : > { %v592_v40 = vrot.slane %v591_v3, 2 }
 0x2b0   : > { %v593_v41 = vmax.f32 %v591_v3, %v592_v40 }
 0x2b2   : > { %v594_v42 = vrot.slane %v593_v41, 1 }
 0x2b4   : > { %v595_v43 = vmax.f32 %v593_v41, %v594_v42 }
 0x2b6   : > { %812 = vmatmul.mubr.msk.f32.vlgmr.msra.gmra.mxu0 %vm428_vm9, %v595_v43 }
 0x376   : > { %v674_v45 = vpop.f32.mrf.mxu0 }
 0x377   : > { %v675_v46 = vadd.f32 %v674_v45, %v604_v44 }
 0x378   : > { %v813_v47 = vpop.f32.mrf.mxu0 }
 0x379   : > { %679 = vst.msk [vmem:[%s270_s17] sm:$0x1] %vm678_vm10, %v675_v46 }
 0x37a   : > { %901 = shalt.err (!%p898_p3)
}
 0x37b   : > { %s902_s9 = scalar_lea.hbm %s1193_s21, 16  ;;  %s906_s15 = scalar_lea.hbm %s1235_s7, 32 }
 0x37c   : > { %p903_p4 = scmp.ne.s32.totalorder %s1193_s21, %s902_s9  ;;  %p907_p9 = scmp.lt.s32.totalorder %s1193_s21, %s1235_s7 }
 0x37d   : > { %p908_p10 = scmp.lt.s32.totalorder %s906_s15, %s902_s9 }
 0x37e   : > { %p904_p7 = pnand %p903_p4, %p1035_p5 }
 0x37f   : > { %p909_p11 = por %p908_p10, %p907_p9 }
 0x380   : > { %p905_p8 = pneg %p904_p7 }
 0x382   : > { %p910_p12 = pnand %p909_p11, %p905_p8 }
 0x384   : > { %913 = shalt.err (!%p910_p12)
}
 0x385   : > { %814 = dma.vmem_to_hbm [thread:$0]  (%p1035_p5), %s694_s18, 16, %s1193_s21, %s681_s22  }
 0x386 PF: > { %p820_p13 = scmp.ge.s32.totalorder %s948_s27, 2  ;;  %s705_s19 = sand.u32 1, %s936_s24  }
 0x387   : > { %s706_s20 = scalar_lea.sflag [#allocation3], %s705_s19 }
 0x388   : > { %p817_p0 = pnand %p820_p13, %p1039_p6 }
 0x38a   : > { %p818_p1 = pneg %p817_p0 }
 0x38c   : > { %931 = dma.done.wait (%p818_p1), %s706_s20, 16  }
 0x38d   : > { %933 = vsyncadd (%p818_p1), %s706_s20, 4294967280  ;;  %p17_p2 = scmp.ge.s32.totalorder %s1022_s30, 4   ;;  %s1238_s24 = smov %s940_s25 }
 0x38e   : > { %s1239_s25 = smov %s944_s26  ;;  %s1240_s26 = smov %s1033_s10 }
 0x38f   : > { %s1241_s27 = smov %s1022_s30  ;;  %19 = sbr.rel (!%p17_p2) target bundleno = 3 (0x3), region = 83 }
 0x394   :  { %710 = vsyncpa [#allocation3], 1 }
 0x395   :  { %712 = vsyncpa [#allocation3 + $0x1], 1 }

</bundles_post_ra>
